<compile_context>
chip_gen: v7x
topology: tpu7x:2x2x1
jax: 0.10.0
libtpu: 0.0.40
codegen_flags: <defaults>
</compile_context>

<pallas_src>
import functools

import jax
import jax.numpy as jnp
import numpy as np
from jax.experimental import pallas as pl
from jax.experimental.pallas import tpu as pltpu


def _vmem_capacity_bytes():
    """Physical VMEM of the current chip; conservative fallback (v7x per-TC)."""
    try:
        info = pltpu.get_tpu_info()
        cap = getattr(info, "vmem_capacity_bytes", None)
        if cap:
            return int(cap)
    except Exception:
        pass
    return 64 * 1024 * 1024


def _id_smooth_kernel(logits_ref, picked_ref, *rest,
                      epsilon, num_classes, batch_total,
                      reduce_flag, single_tile, has_tail):
    # Unpack: [w_ref]  out_ref  [m_sc, se_sc, sl_sc]
    idx = 0
    w_ref = None
    if not reduce_flag:
        w_ref = rest[idx]; idx += 1
    out_ref = rest[idx]; idx += 1
    if single_tile:
        m_sc = se_sc = sl_sc = None
    else:
        m_sc, se_sc, sl_sc = rest[idx], rest[idx + 1], rest[idx + 2]

    x = logits_ref[0].astype(jnp.float32)           # (tb, TC)
    tb, TC = x.shape
    neg_inf = jnp.float32(-jnp.inf)

    def _finalize(lse, sl):
        # per-sample smoothed CE, then per-(part, batch-block) partial loss
        picked = picked_ref[0].astype(jnp.float32)  # (tb, 1)
        s = (1.0 - epsilon) * (lse - picked) \
            + (epsilon / num_classes) * (num_classes * lse - sl)
        if reduce_flag:
            part = jnp.sum(s, axis=0, keepdims=True) * (1.0 / batch_total)
        else:
            part = jnp.sum(w_ref[0] * s, axis=0, keepdims=True) * (1.0 / batch_total)
        out_ref[0] = part

    # ---------- fast path: whole class dim in one tile (c_tile == C) ----------
    if single_tile:
        m = jnp.max(x, axis=1, keepdims=True)
        lse = m + jnp.log(jnp.sum(jnp.exp(x - m), axis=1, keepdims=True))
        sl = jnp.sum(x, axis=1, keepdims=True)
        _finalize(lse, sl)
        return

    # ---------- multi-tile path: online softmax across class tiles ----------
    c = pl.program_id(2)
    nc = pl.num_programs(2)

    @pl.when(c == 0)
    def _():
        m_sc[...] = jnp.full_like(m_sc, -jnp.inf)   # running max
        se_sc[...] = jnp.zeros_like(se_sc)          # running sum exp(x - m)
        sl_sc[...] = jnp.zeros_like(sl_sc)          # running sum of logits

    def _accumulate(x_max, x_sum):
        tile_max = jnp.max(x_max, axis=1, keepdims=True)        # (tb, 1), finite
        m_old = m_sc[...]
        m_new = jnp.maximum(m_old, tile_max)
        se_sc[...] = se_sc[...] * jnp.exp(m_old - m_new) \
            + jnp.sum(jnp.exp(x_max - m_new), axis=1, keepdims=True)
        m_sc[...] = m_new
        sl_sc[...] = sl_sc[...] + jnp.sum(x_sum, axis=1, keepdims=True)

    if has_tail:
        is_tail = c == nc - 1

        @pl.when(jnp.logical_not(is_tail))
        def _():
            _accumulate(x, x)                                    # no mask work

        @pl.when(is_tail)
        def _():
            # scalar-adjusted threshold: valid lanes are [0, num_classes - c*TC)
            rem = num_classes - c * TC
            col = jax.lax.broadcasted_iota(jnp.int32, (tb, TC), 1)
            valid = col < rem
            _accumulate(jnp.where(valid, x, neg_inf),
                        jnp.where(valid, x, 0.0))
    else:
        _accumulate(x, x)                                        # no mask traced

    @pl.when(c == nc - 1)
    def _():
        lse = m_sc[...] + jnp.log(se_sc[...])
        _finalize(lse, sl_sc[...])


def id_smooth_loss(cls_scores, labels, keypoints_confidence, *,
                   epsilon=0.1, reduce=True, loss_weight=1.0,
                   c_tile=None, b_tile=None, vmem_limit_bytes=None):
    """cls_scores: (P, B, C); labels: (B,) int; keypoints_confidence: (B, P)."""
    P, B, C = cls_scores.shape

    # ---- label-logit gather outside the kernel (tiny; XLA handles it) ----
    idx = jnp.broadcast_to(labels.reshape(1, B, 1).astype(jnp.int32), (P, B, 1))
    picked = jnp.take_along_axis(cls_scores, idx, axis=2)        # (P, B, 1), native dtype

    # ---- per-generation VMEM budget ----
    cap = _vmem_capacity_bytes()
    if vmem_limit_bytes is None:
        # 96 MiB on v5e/v6e (128 MiB physical); 48 MiB on v7x (64 MiB physical)
        vmem_limit_bytes = int(min(max(cap - 16 * 2**20, 16 * 2**20), 96 * 2**20))

    # ---- batch blocking (optional; gives v7x megacore a load-balanced grid) ----
    if b_tile is None or b_tile >= B:
        b_tile = B
    else:
        assert B % b_tile == 0, "batch tile must divide B"
        assert b_tile % 8 == 0, "batch tile must be sublane-aligned (16 for bf16)"
    nb = B // b_tile

    # ---- class tiling: largest lane-aligned tile that fits the VMEM budget ----
    itemsize = jnp.dtype(cls_scores.dtype).itemsize
    if c_tile is None:
        budget = int(vmem_limit_bytes * 3 // 4)      # headroom for temps / small blocks
        per_elem = 2 * itemsize + 4                  # double-buffered native + f32 copy
        max_c = budget // (per_elem * b_tile)
        c_tile = min(C, (max_c // 128) * 128)
        if c_tile <= 0:
            c_tile = min(C, 128)
    if c_tile >= C:
        c_tile = C                                   # single tile == full class dim
    else:
        assert c_tile % 128 == 0, "class tile must be lane-aligned"
    nc = pl.cdiv(C, c_tile)
    single_tile = (nc == 1)
    has_tail = (C % c_tile) != 0

    kernel = functools.partial(
        _id_smooth_kernel,
        epsilon=float(epsilon),
        num_classes=int(C),
        batch_total=int(B),
        reduce_flag=bool(reduce),
        single_tile=bool(single_tile),
        has_tail=bool(has_tail),
    )

    in_specs = [
        pl.BlockSpec((1, b_tile, c_tile), lambda p, b, c: (p, b, c)),  # logits tile
        pl.BlockSpec((1, b_tile, 1), lambda p, b, c: (p, b, 0)),       # picked logit
    ]
    args = [cls_scores, picked]                                        # native dtype DMA
    if not reduce:
        # per-sample confidences only needed for the reduce=False path
        w = jnp.transpose(keypoints_confidence, (1, 0)).reshape(P, B, 1)
        args.append(w.astype(jnp.float32))
        in_specs.append(pl.BlockSpec((1, b_tile, 1), lambda p, b, c: (p, b, 0)))

    scratch = [] if single_tile else [pltpu.VMEM((b_tile, 1), jnp.float32)] * 3

    partials = pl.pallas_call(
        kernel,
        out_shape=jax.ShapeDtypeStruct((P * nb, 1, 1), jnp.float32),
        grid_spec=pltpu.PrefetchScalarGridSpec(
            num_scalar_prefetch=0,
            grid=(P, nb, nc),
            in_specs=in_specs,
            out_specs=pl.BlockSpec((1, 1, 1), lambda p, b, c: (p * nb + b, 0, 0)),
            scratch_shapes=scratch,
        ),
        compiler_params=pltpu.CompilerParams(
            dimension_semantics=("parallel", "parallel", "arbitrary"),
            vmem_limit_bytes=int(vmem_limit_bytes),
        ),
    )(*args)

    parts = jnp.sum(partials.reshape(P, nb), axis=1)                   # (P,)
    if reduce:
        # (weights[:, i] * scalar_loss_i).mean() == mean(weights[:, i]) * loss_i
        w_mean = jnp.mean(keypoints_confidence.astype(jnp.float32), axis=0)
        loss = jnp.sum(parts * w_mean)
    else:
        loss = jnp.sum(parts)
    return loss * jnp.float32(loss_weight)


def _reference_loss(cls_scores, labels, keypoints_confidence, *,
                    epsilon, reduce, loss_weight):
    """Pure-JAX reference mirroring the PyTorch forward."""
    P, B, C = cls_scores.shape
    onehot = jax.nn.one_hot(labels, C, dtype=jnp.float32)
    targets = (1.0 - epsilon) * onehot + epsilon / C
    total = jnp.float32(0.0)
    for i in range(P):
        lp = jax.nn.log_softmax(cls_scores[i].astype(jnp.float32), axis=1)
        if reduce:
            li = (-targets * lp).mean(0).sum()
            li = (keypoints_confidence[:, i] * li).mean()
        else:
            li = (-targets * lp).sum(1)
            li = (keypoints_confidence[:, i] * li).mean()
        total = total + li
    return total * loss_weight


if __name__ == "__main__":
    key = jax.random.PRNGKey(0)
    k1, k2, k3, k4, k5, k6 = jax.random.split(key, 6)

    # Test 1: small shapes, f32, reduce=True (single class tile fast path)
    P, B, C = 3, 8, 16
    cls_scores = jax.random.normal(k1, (P, B, C), dtype=jnp.float32)
    labels = jax.random.randint(k2, (B,), 0, C, dtype=jnp.int32)
    kp_conf = jax.random.uniform(k3, (B, P), dtype=jnp.float32)

    out = jax.block_until_ready(
        id_smooth_loss(cls_scores, labels, kp_conf,
                       epsilon=0.1, reduce=True, loss_weight=1.0))
    ref = jax.block_until_ready(
        _reference_loss(cls_scores, labels, kp_conf,
                        epsilon=0.1, reduce=True, loss_weight=1.0))
    np.testing.assert_allclose(np.asarray(out), np.asarray(ref),
                               rtol=1e-5, atol=1e-5)

    # Test 2: same inputs, reduce=False path (per-sample confidence weighting)
    out = jax.block_until_ready(
        id_smooth_loss(cls_scores, labels, kp_conf,
                       epsilon=0.1, reduce=False, loss_weight=0.7))
    ref = jax.block_until_ready(
        _reference_loss(cls_scores, labels, kp_conf,
                        epsilon=0.1, reduce=False, loss_weight=0.7))
    np.testing.assert_allclose(np.asarray(out), np.asarray(ref),
                               rtol=1e-5, atol=1e-5)

    # Test 3: bf16 logits + multiple class tiles with a masked tail (C=300, TC=128)
    P2, B2, C2 = 2, 8, 300
    cls2 = jax.random.normal(k4, (P2, B2, C2), dtype=jnp.float32).astype(jnp.bfloat16)
    lab2 = jax.random.randint(k2, (B2,), 0, C2, dtype=jnp.int32)
    kp2 = jax.random.uniform(k3, (B2, P2), dtype=jnp.float32)

    out = jax.block_until_ready(
        id_smooth_loss(cls2, lab2, kp2,
                       epsilon=0.1, reduce=True, loss_weight=1.3, c_tile=128))
    ref = jax.block_until_ready(
        _reference_loss(cls2, lab2, kp2,
                        epsilon=0.1, reduce=True, loss_weight=1.3))
    np.testing.assert_allclose(np.asarray(out), np.asarray(ref),
                               rtol=1e-5, atol=1e-5)

    # Test 4: batch-block grid axis (B=16, b_tile=8) + multi-tile, no tail (C=256)
    P3, B3, C3 = 2, 16, 256
    cls3 = jax.random.normal(k5, (P3, B3, C3), dtype=jnp.float32)
    lab3 = jax.random.randint(k6, (B3,), 0, C3, dtype=jnp.int32)
    kp3 = jax.random.uniform(k3, (B3, P3), dtype=jnp.float32)

    out = jax.block_until_ready(
        id_smooth_loss(cls3, lab3, kp3, epsilon=0.1, reduce=False,
                       loss_weight=1.0, c_tile=128, b_tile=8))
    ref = jax.block_until_ready(
        _reference_loss(cls3, lab3, kp3, epsilon=0.1, reduce=False,
                        loss_weight=1.0))
    np.testing.assert_allclose(np.asarray(out), np.asarray(ref),
                               rtol=1e-5, atol=1e-5)

    print("KERNEL_OK")
</pallas_src>

<mosaic_0001>
module attributes {stable_mosaic.version = 11 : i64} {
  func.func @_id_smooth_kernel(%arg0: i32, %arg1: i32, %arg2: i32, %arg3: memref<1x8x16xf32, #tpu.memory_space<vmem>>, %arg4: memref<1x8x1xf32, #tpu.memory_space<vmem>>, %arg5: memref<1x1x1xf32, #tpu.memory_space<vmem>>) attributes {dimension_semantics = [#tpu.dimension_semantics<parallel>, #tpu.dimension_semantics<parallel>, #tpu.dimension_semantics<arbitrary>], iteration_bounds = array<i64: 3, 1, 1>, scalar_prefetch = 0 : i64, scratch_operands = 0 : i64, tpu.core_type = #tpu.core_type<tc>, window_params = [{transform_indices = @transform_0, window_bounds = array<i64: 1, 8, 16>}, {transform_indices = @transform_1, window_bounds = array<i64: 1, 8, 1>}, {transform_indices = @transform_2, window_bounds = array<i64: 1, 1, 1>}]} {
    %c0 = arith.constant 0 : index
    %c0_0 = arith.constant 0 : index
    %c0_1 = arith.constant 0 : index
    %0 = vector.load %arg3[%c0, %c0_0, %c0_1] : memref<1x8x16xf32, #tpu.memory_space<vmem>>, vector<1x8x16xf32>
    %1 = vector.shape_cast %0 : vector<1x8x16xf32> to vector<8x16xf32>
    %cst = arith.constant dense<0xFF800000> : vector<8xf32>
    %2 = vector.multi_reduction <maximumf>, %1, %cst [1] : vector<8x16xf32> to vector<8xf32>
    %3 = vector.shape_cast %2 : vector<8xf32> to vector<8x1xf32>
    %4 = vector.broadcast %3 : vector<8x1xf32> to vector<8x16xf32>
    %5 = arith.subf %1, %4 : vector<8x16xf32>
    %6 = math.exp %5 : vector<8x16xf32>
    %cst_2 = arith.constant dense<0.000000e+00> : vector<8xf32>
    %7 = vector.multi_reduction <add>, %6, %cst_2 [1] : vector<8x16xf32> to vector<8xf32>
    %8 = vector.shape_cast %7 : vector<8xf32> to vector<8x1xf32>
    %9 = math.log %8 : vector<8x1xf32>
    %10 = arith.addf %3, %9 : vector<8x1xf32>
    %cst_3 = arith.constant dense<0.000000e+00> : vector<8xf32>
    %11 = vector.multi_reduction <add>, %1, %cst_3 [1] : vector<8x16xf32> to vector<8xf32>
    %12 = vector.shape_cast %11 : vector<8xf32> to vector<8x1xf32>
    %c0_4 = arith.constant 0 : index
    %c0_5 = arith.constant 0 : index
    %c0_6 = arith.constant 0 : index
    %13 = vector.load %arg4[%c0_4, %c0_5, %c0_6] : memref<1x8x1xf32, #tpu.memory_space<vmem>>, vector<1x8x1xf32>
    %14 = vector.shape_cast %13 : vector<1x8x1xf32> to vector<8x1xf32>
    %15 = arith.subf %10, %14 : vector<8x1xf32>
    %cst_7 = arith.constant 0.899999976 : f32
    %16 = vector.broadcast %cst_7 : f32 to vector<8x1xf32>
    %17 = arith.mulf %16, %15 : vector<8x1xf32>
    %cst_8 = arith.constant 1.600000e+01 : f32
    %18 = vector.broadcast %cst_8 : f32 to vector<8x1xf32>
    %19 = arith.mulf %18, %10 : vector<8x1xf32>
    %20 = arith.subf %19, %12 : vector<8x1xf32>
    %cst_9 = arith.constant 6.250000e-03 : f32
    %21 = vector.broadcast %cst_9 : f32 to vector<8x1xf32>
    %22 = arith.mulf %21, %20 : vector<8x1xf32>
    %23 = arith.addf %17, %22 : vector<8x1xf32>
    %cst_10 = arith.constant dense<0.000000e+00> : vector<1xf32>
    %24 = vector.multi_reduction <add>, %23, %cst_10 [0] : vector<8x1xf32> to vector<1xf32>
    %25 = vector.shape_cast %24 : vector<1xf32> to vector<1x1xf32>
    %cst_11 = arith.constant 1.250000e-01 : f32
    %26 = vector.broadcast %cst_11 : f32 to vector<1x1xf32>
    %27 = arith.mulf %25, %26 : vector<1x1xf32>
    %c0_12 = arith.constant 0 : index
    %c0_13 = arith.constant 0 : index
    %c0_14 = arith.constant 0 : index
    %28 = vector.load %arg5[%c0_12, %c0_13, %c0_14] : memref<1x1x1xf32, #tpu.memory_space<vmem>>, vector<1x1x1xf32>
    %29 = vector.shape_cast %28 : vector<1x1x1xf32> to vector<1x1xf32>
    %30 = vector.shape_cast %27 : vector<1x1xf32> to vector<1x1x1xf32>
    tpu.vector_store %arg5[%c0_12, %c0_13, %c0_14], %30 {strides = array<i32>} : memref<1x1x1xf32, #tpu.memory_space<vmem>>, vector<1x1x1xf32>,
    return
  }
  func.func @transform_0(%arg0: i32, %arg1: i32, %arg2: i32) -> (i32, i32, i32) {
    %c0_i32 = arith.constant 0 : i32
    return %arg0, %arg1, %arg2 : i32, i32, i32
  }
  func.func @transform_1(%arg0: i32, %arg1: i32, %arg2: i32) -> (i32, i32, i32) {
    %c0_i32 = arith.constant 0 : i32
    %c0_i32_0 = arith.constant 0 : i32
    return %arg0, %arg1, %c0_i32 : i32, i32, i32
  }
  func.func @transform_2(%arg0: i32, %arg1: i32, %arg2: i32) -> (i32, i32, i32) {
    %c1_i32 = arith.constant 1 : i32
    %0 = arith.muli %arg0, %c1_i32 : i32
    %1 = arith.addi %0, %arg1 : i32
    %c0_i32 = arith.constant 0 : i32
    %c0_i32_0 = arith.constant 0 : i32
    %c0_i32_1 = arith.constant 0 : i32
    return %1, %c0_i32, %c0_i32_0 : i32, i32, i32
  }
}

</mosaic_0001>

<bundles_post_ra>
// kernel: tpu_custom_call.1
= control target key start
LH: loop header
LB: loop body
LE: loop exit
PB: predicated region body
PF: predicated region fallthrough
CT: control target
= control target key end

     0   :  { %s405_s9 = smov 0   ;;  %s407_s10 = smov 0   ;;  %s445_s0 = inlined_call_operand.vmem [shape: f32[3,8,16], index: 0, kind: input, shape index: {}]   ;;  %s446_s1 = inlined_call_operand.vmem [shape: f32[3,8,1], index: 1, kind: input, shape index: {}]   ;;  %s447_s2 = inlined_call_operand.vmem [shape: f32[3,1,1], index: 2, kind: output, shape index: {}]  }
   0x1   :  { %s409_s11 = smov 0  }
   0x2 LB: > { %s31_s12 = sadd.s32 1, %s384_s10  ;;  %p333_p0 = scmp.ge.s32.totalorder %s388_s11, 1  ;;  %s388_s11 = sphi %s409_s11, %s12_s11   ;;  %s384_s10 = sphi %s407_s10, %s449_s10   ;;  %s380_s9 = sphi %s405_s9, %s448_s9  }
   0x3   : > { %p33_p1 = scmp.ge.s32.totalorder %s31_s12, 3  ;;  %p156_p2 = scmp.lt.s32.totalorder %s388_s11, 4 }
   0x5   : > { %s451_s12 = smov (%p33_p1, %s31_s12), 0  ;;  %p157_p3 = pnand %p333_p0, %p156_p2 }
   0x6   : > { %p189_p4 = scmp.lt.s32.totalorder (!%p157_p3), %s380_s9, 2  ;;  %vm212_vm0 = vcmask (!%p157_p3), 130048   ;;  %vm235_vm1 = vcmask (!%p157_p3), 7168   ;;  %vm244_vm2 = vcmask (!%p157_p3), 0  }
   0x7   : > { %160 = sbr.rel (%p157_p3) target bundleno = 358 (0x166), region = 28 }
   0xe   : > { %s453_s9 = smov (!%p189_p4, %s380_s9), 2 }
   0xf   : > { %s334_s13 = sshll.u32 %s453_s9, 3  ;;  %s209_s22 = scalar_lea.vmem %s447_s2, %s453_s9 }
  0x10   : > { %s198_s16 = scalar_lea.vmem %s445_s0, %s334_s13  ;;  %s205_s19 = scalar_lea.vmem %s446_s1, %s334_s13 }
  0x11   : > { %v211_v0 = vld [vmem:[%s198_s16] sm:$0xff] }
  0x12   : > { %v213_v1 = vsel %vm212_vm0, %v211_v0, -inf  ;;  %v225_v2 = vsel %vm212_vm0, %v211_v0, 0.0  ;;  %v228_v11 = vld [vmem:[%s205_s19] sm:$0xff] }
  0x13   : > { %214 = vmax.xlane.f32.xlu0 %v213_v1  ;;  %226 = vadd.xlane.f32.xlu1 %v225_v2 }
  0xa0   : > { %v215_v3 = vpop.xlane.xlu0 %214  ;;  %v227_v13 = vpop.xlane.xlu1 %226 }
  0xa1   : > { %v216_v4 = vsub.f32 %v211_v0, %v215_v3 }
  0xa3   : > { %v217_v5 = vmul.f32 1.442695, %v216_v4 }
  0xa5   : > { %362 = vpow2.f32 %v217_v5 }
  0xaf   : > { %v363_v6 = vpop.eup %362 }
  0xb0   : > { %v219_v7 = vsel %vm212_vm0, %v363_v6, 0.0 }
  0xb1   : > { %220 = vadd.xlane.f32.xlu0 %v219_v7 }
 0x13e   : > { %v221_v8 = vpop.xlane.xlu0 %220 }
 0x13f   : > { %364 = vlog2.f32 %v221_v8 }
 0x149   : > { %v365_v9 = vpop.eup %364 }
 0x14a   : > { %v223_v10 = vmul.f32 0.6931472, %v365_v9 }
 0x14c   : > { %v224_v12 = vadd.f32 %v223_v10, %v215_v3 }
 0x14e   : > { %v229_v14 = vsub.f32 %v224_v12, %v228_v11  ;;  %v231_v15 = vmul.f32 16.0, %v224_v12 }
 0x150   : > { %v232_v16 = vsub.f32 %v231_v15, %v227_v13  ;;  %v230_v17 = vmul.f32 0.9, %v229_v14 }
 0x152   : > { %v233_v18 = vmul.f32 0.00625, %v232_v16 }
 0x154   : > { %v234_v19 = vadd.f32 %v233_v18, %v230_v17 }
 0x156   : > { %v236_v20 = vsel %vm235_vm1, %v234_v19, 0.0 }
 0x157   : > { %v237_v21 = vrot.slane %v236_v20, 4 }
 0x159   : > { %v238_v22 = vadd.f32 %v237_v21, %v236_v20 }
 0x15b   : > { %v239_v23 = vrot.slane %v238_v22, 2 }
 0x15d   : > { %v240_v24 = vadd.f32 %v239_v23, %v238_v22 }
 0x15f   : > { %v241_v25 = vrot.slane %v240_v24, 1 }
 0x161   : > { %v242_v26 = vadd.f32 %v241_v25, %v240_v24 }
 0x163   : > { %v243_v27 = vmul.f32 0.125, %v242_v26 }
 0x165   : > { %245 = vst.msk [vmem:[%s209_s22] sm:$0x1] %vm244_vm2, %v243_v27 }
 0x166 PF: > { %s12_s11 = sadd.s32 1, %s388_s11   ;;  %s448_s9 = smov %s384_s10 }
 0x167   : > { %p9_p5 = scmp.ge.s32.totalorder %s12_s11, 5   ;;  %s449_s10 = smov %s451_s12 }
 0x169   :  { %11 = sbr.rel (!%p9_p5) target bundleno = 2 (0x2), region = 61 }

</bundles_post_ra>
